<compile_context>
chip_gen: v5e
topology: v5e:2x2
jax: 0.10.0
libtpu: 0.0.40
codegen_flags: <defaults>
</compile_context>

<pallas_src>
import functools

import jax
import jax.numpy as jnp
from jax.experimental import pallas as pl
from jax.experimental.pallas import tpu as pltpu


def _layernorm_kernel(x_ref, gamma_ref, beta_ref, o_ref, *, eps):
    # x_ref: (tile_rows, D); gamma_ref / beta_ref: (1, D), already f32.
    x = x_ref[...].astype(jnp.float32)
    d = x.shape[-1]
    mean = jnp.mean(x, axis=-1, keepdims=True)
    diff = x - mean
    # torch.std default: unbiased estimator (divide by N - 1).
    var = jnp.sum(diff * diff, axis=-1, keepdims=True) * (1.0 / (d - 1))
    std_eps = jnp.sqrt(var) + eps          # eps added to std (module semantics)
    # EUP approximate reciprocal (separate bundle slot) + one Newton step on
    # (tile, 1)-shaped data -> ~f32-exact at negligible VPU cost.
    r = pl.reciprocal(std_eps, approx=True)
    inv = r * (2.0 - std_eps * r)
    y = gamma_ref[...] * (diff * inv) + beta_ref[...]
    o_ref[...] = y.astype(o_ref.dtype)


def _round_up(x, m):
    return ((x + m - 1) // m) * m


def _tpu_vmem_bytes():
    """Per-TensorCore VMEM capacity; conservative 64 MiB fallback."""
    try:
        info = pltpu.get_tpu_info()
        v = getattr(info, "vmem_capacity_bytes", None)
        if v:
            return int(v)
    except Exception:
        pass
    return 64 * 1024 * 1024


def _pick_tile_rows(rows, d, itemsize, row_align, vmem_bytes, multi_core):
    # VMEM per block row:
    #   2x input + 2x output double buffers           -> 4 * itemsize
    #   ~3 live (tile, D) f32 temporaries in-kernel   -> 12 bytes
    per_row_vmem = d * (4 * itemsize + 3 * 4)
    vmem_budget = int(vmem_bytes * 0.65)
    t = max(row_align, vmem_budget // per_row_vmem)
    # Cap per-block input I/O at ~16 MiB (far past the 0.35 us/step knee).
    t = min(t, max(row_align, (16 << 20) // (d * itemsize)))
    t = max(row_align, (t // row_align) * row_align)
    t = min(t, _round_up(rows, row_align))

    if multi_core:
        # Round the grid to an even number of steps so both TensorCores get
        # equal work; single-core chips skip this (extra steps only add
        # per-step overhead there).
        steps = pl.cdiv(rows, t)
        if steps % 2 == 1:
            steps = max(2, steps + 1)
            t = max(row_align, _round_up(pl.cdiv(rows, steps), row_align))
    return t


def layer_norm(x, gamma, beta, eps=1e-6, *, tile_rows=None):
    """x: (..., feature_dim); gamma, beta: (feature_dim,)."""
    orig_shape = x.shape
    d = orig_shape[-1]
    assert d > 1, "feature_dim must be > 1 (unbiased std divides by N-1)"
    x2 = x.reshape(-1, d)
    rows = x2.shape[0]
    itemsize = jnp.dtype(x2.dtype).itemsize
    # Sublane alignment: 8 rows for 32-bit, 16 for bf16, 32 for 8-bit.
    row_align = max(8, 32 // max(1, itemsize))

    vmem_bytes = _tpu_vmem_bytes()
    # 64 MiB/TC chips (v7x) have 2 TensorCores; 128 MiB chips (v5e/v6e) have 1.
    multi_core = vmem_bytes <= 64 * 1024 * 1024

    if tile_rows is None:
        tile_rows = _pick_tile_rows(rows, d, itemsize, row_align,
                                    vmem_bytes, multi_core)
    else:
        assert tile_rows % row_align == 0, "tile_rows must respect sublane alignment"
        tile_rows = min(tile_rows, _round_up(rows, row_align))

    grid = (pl.cdiv(rows, tile_rows),)

    # Cast params to f32 once here (not per grid step inside the kernel).
    gamma2 = gamma.reshape(1, d).astype(jnp.float32)
    beta2 = beta.reshape(1, d).astype(jnp.float32)

    out = pl.pallas_call(
        functools.partial(_layernorm_kernel, eps=eps),
        out_shape=jax.ShapeDtypeStruct((rows, d), x.dtype),
        grid_spec=pltpu.PrefetchScalarGridSpec(
            num_scalar_prefetch=0,
            grid=grid,
            in_specs=[
                pl.BlockSpec((tile_rows, d), lambda i: (i, 0)),
                pl.BlockSpec((1, d), lambda i: (0, 0)),
                pl.BlockSpec((1, d), lambda i: (0, 0)),
            ],
            out_specs=pl.BlockSpec((tile_rows, d), lambda i: (i, 0)),
        ),
        compiler_params=pltpu.CompilerParams(
            dimension_semantics=("parallel",),
            # Derived per generation: ~108 MiB on 128 MiB-VMEM chips,
            # ~54 MiB on 64 MiB-VMEM chips.  Actual modeled use is <= 0.65x.
            vmem_limit_bytes=int(vmem_bytes * 0.85),
        ),
    )(x2, gamma2, beta2)

    return out.reshape(orig_shape)


def _reference(x, gamma, beta, eps):
    d = x.shape[-1]
    mean = jnp.mean(x, axis=-1, keepdims=True)
    std = jnp.sqrt(jnp.sum((x - mean) ** 2, axis=-1, keepdims=True) / (d - 1))
    return gamma * (x - mean) / (std + eps) + beta


if __name__ == "__main__":
    key = jax.random.PRNGKey(0)
    eps = 1e-6

    # Shapes consistent with the module: (batch=2, seq=8, hidden=32).
    B, S, D = 2, 8, 32
    gamma = jnp.ones((D,), dtype=jnp.float32)
    beta = jnp.zeros((D,), dtype=jnp.float32)

    k1, k2 = jax.random.split(key)
    x = jax.random.normal(k1, (B, S, D), dtype=jnp.float32)
    out = jax.block_until_ready(layer_norm(x, gamma, beta, eps))
    ref = _reference(x, gamma, beta, eps)
    assert jnp.allclose(out, ref, atol=2e-4, rtol=2e-4), "mismatch vs reference"

    # Ragged row count (rows % tile_rows != 0) exercises the padless cdiv grid
    # with a partial last block.
    x2 = jax.random.normal(k2, (3, 7, D), dtype=jnp.float32)
    out2 = jax.block_until_ready(layer_norm(x2, gamma, beta, eps))
    ref2 = _reference(x2, gamma, beta, eps)
    assert jnp.allclose(out2, ref2, atol=2e-4, rtol=2e-4), "ragged-tile mismatch"

    print("KERNEL_OK")
</pallas_src>

<mosaic_0001>
module attributes {stable_mosaic.version = 11 : i64} {
  func.func @_layernorm_kernel(%arg0: i32, %arg1: memref<8x32xf32, #tpu.memory_space<vmem>>, %arg2: memref<1x32xf32, #tpu.memory_space<vmem>>, %arg3: memref<1x32xf32, #tpu.memory_space<vmem>>, %arg4: memref<8x32xf32, #tpu.memory_space<vmem>>) attributes {dimension_semantics = [#tpu.dimension_semantics<parallel>], iteration_bounds = array<i64: 2>, scalar_prefetch = 0 : i64, scratch_operands = 0 : i64, tpu.core_type = #tpu.core_type<tc>, window_params = [{transform_indices = @transform_0, window_bounds = array<i64: 8, 32>}, {pipeline_mode = #tpu.pipeline_mode<synchronous>, transform_indices = @transform_1, window_bounds = array<i64: 1, 32>}, {pipeline_mode = #tpu.pipeline_mode<synchronous>, transform_indices = @transform_2, window_bounds = array<i64: 1, 32>}, {transform_indices = @transform_3, window_bounds = array<i64: 8, 32>}]} {
    %c0 = arith.constant 0 : index
    %c0_0 = arith.constant 0 : index
    %0 = vector.load %arg1[%c0, %c0_0] : memref<8x32xf32, #tpu.memory_space<vmem>>, vector<8x32xf32>
    %cst = arith.constant dense<0.000000e+00> : vector<8xf32>
    %1 = vector.multi_reduction <add>, %0, %cst [1] : vector<8x32xf32> to vector<8xf32>
    %2 = vector.shape_cast %1 : vector<8xf32> to vector<8x1xf32>
    %cst_1 = arith.constant 3.200000e+01 : f32
    %3 = vector.broadcast %cst_1 : f32 to vector<8x1xf32>
    %4 = arith.divf %2, %3 : vector<8x1xf32>
    %5 = vector.broadcast %4 : vector<8x1xf32> to vector<8x32xf32>
    %6 = arith.subf %0, %5 : vector<8x32xf32>
    %7 = arith.mulf %6, %6 : vector<8x32xf32>
    %cst_2 = arith.constant dense<0.000000e+00> : vector<8xf32>
    %8 = vector.multi_reduction <add>, %7, %cst_2 [1] : vector<8x32xf32> to vector<8xf32>
    %9 = vector.shape_cast %8 : vector<8xf32> to vector<8x1xf32>
    %cst_3 = arith.constant 0.0322580636 : f32
    %10 = vector.broadcast %cst_3 : f32 to vector<8x1xf32>
    %11 = arith.mulf %9, %10 : vector<8x1xf32>
    %12 = math.sqrt %11 : vector<8x1xf32>
    %cst_4 = arith.constant 9.99999997E-7 : f32
    %13 = vector.broadcast %cst_4 : f32 to vector<8x1xf32>
    %14 = arith.addf %12, %13 : vector<8x1xf32>
    %15 = tpu.reciprocal %14 {approx = true} : vector<8x1xf32> -> vector<8x1xf32>
    %16 = arith.mulf %14, %15 : vector<8x1xf32>
    %cst_5 = arith.constant 2.000000e+00 : f32
    %17 = vector.broadcast %cst_5 : f32 to vector<8x1xf32>
    %18 = arith.subf %17, %16 : vector<8x1xf32>
    %19 = arith.mulf %15, %18 : vector<8x1xf32>
    %c0_6 = arith.constant 0 : index
    %c0_7 = arith.constant 0 : index
    %20 = vector.load %arg2[%c0_6, %c0_7] : memref<1x32xf32, #tpu.memory_space<vmem>>, vector<1x32xf32>
    %21 = vector.broadcast %19 : vector<8x1xf32> to vector<8x32xf32>
    %22 = arith.mulf %6, %21 : vector<8x32xf32>
    %23 = vector.broadcast %20 : vector<1x32xf32> to vector<8x32xf32>
    %24 = arith.mulf %23, %22 : vector<8x32xf32>
    %c0_8 = arith.constant 0 : index
    %c0_9 = arith.constant 0 : index
    %25 = vector.load %arg3[%c0_8, %c0_9] : memref<1x32xf32, #tpu.memory_space<vmem>>, vector<1x32xf32>
    %26 = vector.broadcast %25 : vector<1x32xf32> to vector<8x32xf32>
    %27 = arith.addf %24, %26 : vector<8x32xf32>
    %c0_10 = arith.constant 0 : index
    %c0_11 = arith.constant 0 : index
    %28 = vector.load %arg4[%c0_10, %c0_11] : memref<8x32xf32, #tpu.memory_space<vmem>>, vector<8x32xf32>
    tpu.vector_store %arg4[%c0_10, %c0_11], %27 {strides = array<i32>} : memref<8x32xf32, #tpu.memory_space<vmem>>, vector<8x32xf32>,
    return
  }
  func.func @transform_0(%arg0: i32) -> (i32, i32) {
    %c0_i32 = arith.constant 0 : i32
    %c0_i32_0 = arith.constant 0 : i32
    return %arg0, %c0_i32 : i32, i32
  }
  func.func @transform_1(%arg0: i32) -> (i32, i32) {
    %c0_i32 = arith.constant 0 : i32
    %c0_i32_0 = arith.constant 0 : i32
    %c0_i32_1 = arith.constant 0 : i32
    return %c0_i32, %c0_i32_0 : i32, i32
  }
  func.func @transform_2(%arg0: i32) -> (i32, i32) {
    %c0_i32 = arith.constant 0 : i32
    %c0_i32_0 = arith.constant 0 : i32
    %c0_i32_1 = arith.constant 0 : i32
    return %c0_i32, %c0_i32_0 : i32, i32
  }
  func.func @transform_3(%arg0: i32) -> (i32, i32) {
    %c0_i32 = arith.constant 0 : i32
    %c0_i32_0 = arith.constant 0 : i32
    return %arg0, %c0_i32 : i32, i32
  }
}

</mosaic_0001>

<bundles_post_ra>
// kernel: tpu_custom_call.1
= control target key start
LH: loop header
LB: loop body
LE: loop exit
PB: predicated region body
PF: predicated region fallthrough
CT: control target
= control target key end

     0   :  { %8 = vsyncpa [#allocation3], 0  ;;  %s729_s0 = inlined_call_operand.hbm [shape: f32[16,32], index: 0, kind: input, shape index: {}]   ;;  %s730_s1 = inlined_call_operand.hbm [shape: f32[1,32], index: 1, kind: input, shape index: {}]   ;;  %s731_s2 = inlined_call_operand.vmem [shape: f32[1,32], index: 2, kind: input, shape index: {}]   ;;  %s732_s3 = inlined_call_operand.hbm [shape: f32[16,32], index: 3, kind: output, shape index: {}]  }
   0x1   :  { %10 = vsyncpa [#allocation3 + $0x1], 0 }
   0x2   :  { %11 = vsyncpa [#allocation6], 0 }
   0x3   :  { %12 = vsyncpa [#allocation4], 0 }
   0x4   :  { %14 = vsyncpa [#allocation4 + $0x1], 0  ;;  %s581_s12 = smov 0   ;;  %s583_s13 = smov 0  }
   0x5   :  { %s585_s14 = smov 0   ;;  %s587_s15 = smov 0  }
   0x6 LB: > { %s602_s16 = sadd.s32 4294967295, %s557_s15   ;;  %s347_s17 = sadd.s32 4294967294, %s557_s15   ;;  %s557_s15 = sphi %s587_s15, %s742_s15   ;;  %s553_s14 = sphi %s585_s14, %s741_s14   ;;  %s549_s13 = sphi %s583_s13, %s740_s13   ;;  %s545_s12 = sphi %s581_s12, %s739_s12  }
   0x7   : > { %p40_p0 = scmp.ne.s32.totalorder %s549_s13, %s545_s12  ;;  %p41_p1 = scmp.eq.s32.totalorder %s602_s16, 0 }
   0x8   : > { %p106_p2 = scmp.eq.s32.totalorder %s602_s16, 1  ;;  %p112_p3 = scmp.eq.s32.totalorder %s347_s17, 1 }
   0x9   : > { %p611_p4 = por %p41_p1, %p40_p0  ;;  %p348_p5 = scmp.ge.s32.totalorder %s557_s15, 1 }
   0xa   : > { %p616_p6 = por %p112_p3, %p40_p0  ;;  %p119_p7 = scmp.lt.s32.totalorder %s557_s15, 3 }
   0xb   : > { %s131_s22 = sshll.u32 %s730_s1, 4  ;;  %s559_s24 = smov [#allocation5]   ;;  %s132_s22 = int_to_ptr.hbm [resolvable:$true] %s131_s22 }
   0xc   : > { %p624_p8 = pnand %p348_p5, %p119_p7  ;;  %s133_s25 = sshll.u32 %s559_s24, 4  ;;  %s134_s25 = int_to_ptr.vmem [resolvable:$true] %s133_s25 }
   0xd   : > { %s634_s26 = sadd.s32 1, %s557_s15   ;;  %s27_s27 = sadd.s32 1, %s553_s14 }
   0xe   : > { %p369_p10 = pneg %p624_p8  ;;  %s24_s28 = ssub.s32 %s557_s15, %s634_s26 }
   0xf   : > { %p25_p12 = scmp.eq.s32.totalorder %s24_s28, 0  ;;  %p34_p13 = scmp.ne.s32.totalorder %s553_s14, %s549_s13 }
  0x10   : > { %p370_p11 = pnand %p369_p10, %p41_p1  ;;  %p35_p0 = scmp.eq.s32.totalorder %s557_s15, 0 }
  0x11   : > { %s643_s29 = scalar_select %p25_p12, %s553_s14, %s27_s27  }
  0x12   : > { %372 = dma.hbm_to_vmem [thread:$0]  (!%p370_p11), %s132_s22, 16, %s134_s25, [#allocation6]  }
  0x13   : > { %p647_p3 = por %p106_p2, %p34_p13  ;;  %p382_p5 = scmp.lt.s32.totalorder %s557_s15, 2 }
  0x14   : > { %s147_s4 = sand.u32 1, %s553_s14   ;;  %s352_s5 = sshll.u32 %s557_s15, 3 }
  0x15   : > { %p36_p7 = por %p35_p0, %p34_p13  ;;  %s351_s6 = sshll.u32 %s147_s4, 3 }
  0x16   : > { %s155_s9 = scalar_lea.hbm %s729_s0, %s352_s5  ;;  %s151_s11 = scalar_lea.vmem [#allocation2], %s351_s6 }
  0x17   : > { %s157_s10 = sshll.u32 %s155_s9, 4  ;;  %s159_s17 = sshll.u32 %s151_s11, 4  ;;  %s158_s10 = int_to_ptr.hbm [resolvable:$true] %s157_s10  ;;  %s160_s17 = int_to_ptr.vmem [resolvable:$true] %s159_s17 }
  0x18   : > { %p657_p10 = pnand %p382_p5, %p36_p7  ;;  %s148_s21 = scalar_lea.sflag [#allocation3], %s147_s4 }
  0x19   : > { %s457_s22 = sshra.s32 %s158_s10, 4  ;;  %s464_s28 = scalar_lea.hbm %s729_s0, 16  ;;  %s458_s22 = int_to_ptr.hbm [resolvable:$true] %s457_s22 }
  0x1a   : > { %s459_s24 = scalar_lea.hbm %s458_s22, 8  ;;  %p461_p11 = pneg %p657_p10 }
  0x1b   : > { %p460_p2 = scmp.ne.s32.totalorder %s458_s22, %s459_s24  ;;  %p465_p0 = scmp.lt.s32.totalorder %s458_s22, %s729_s0 }
  0x1c   : > { %p466_p5 = scmp.lt.s32.totalorder %s464_s28, %s459_s24 }
  0x1d   : > { %p462_p12 = pnand %p461_p11, %p460_p2 }
  0x1e   : > { %p467_p7 = por %p466_p5, %p465_p0 }
  0x1f   : > { %p463_p13 = pneg %p462_p12 }
  0x21   : > { %p468_p9 = pnand %p467_p7, %p463_p13 }
  0x23   : > { %471 = shalt.err (!%p468_p9)
}
  0x24   : > { %376 = dma.hbm_to_vmem [thread:$0]  (!%p657_p10), %s158_s10, 128, %s160_s17, %s148_s21  }
  0x25   : > { %168 = sbr.rel (%p624_p8) target bundleno = 333 (0x14d), region = 32  ;;  %s674_s4 = sand.u32 (!%p624_p8), 1, %s549_s13  }
  0x26   : > { %s354_s7 = sshll.u32 (!%p624_p8), %s674_s4, 3  ;;  %s171_s8 = scalar_lea.sflag (!%p624_p8), [#allocation3], %s674_s4 }
  0x27   : > { %s174_s9 = scalar_lea.vmem (!%p624_p8), [#allocation2], %s354_s7 }
  0x2a   : > { %532 = dma.done.wait (%p611_p4), %s171_s8, 128  }
  0x2b   : > { %534 = vsyncadd (%p611_p4), %s171_s8, 4294967168 }
  0x2c   : > { %536 = dma.done.wait (%p41_p1), [#allocation6], 16  }
  0x2d   : > { %538 = vsyncadd (%p41_p1), [#allocation6], 4294967280  ;;  %vm204_vm0 = vcmask 261120   ;;  %v203_v0 = vld [vmem:[%s174_s9] sm:$0xff]  ;;  %v560_v2 = vmov 32.0   ;;  %s358_s18 = sshll.u32 %s602_s16, 3 }
  0x2e   : > { %v205_v1 = vsel %vm204_vm0, %v203_v0, 0.0  ;;  %421 = vrcp.f32 %v560_v2  ;;  %v419_v31 = vld [vmem:[#allocation5] ss:$0 sm:$0xff]  ;;  %s262_s11 = scalar_lea.hbm %s732_s3, %s358_s18  ;;  %v420_v33 = vld [vmem:[%s731_s2] ss:$0 sm:$0xff]  ;;  %s202_s21 = scalar_lea.vmem [#allocation7], %s354_s7 }
  0x2f   : > { %206 = vadd.xlane.f32.xlu0 %v205_v1  ;;  %s264_s22 = sshll.u32 %s202_s21, 4  ;;  %s266_s24 = sshll.u32 %s262_s11, 4  ;;  %s265_s22 = int_to_ptr.vmem [resolvable:$true] %s264_s22  ;;  %s267_s24 = int_to_ptr.hbm [resolvable:$true] %s266_s24 }
  0x30   : > { %s252_s16 = scalar_lea.sflag [#allocation4], %s674_s4  ;;  %s501_s25 = sshra.s32 %s267_s24, 4  ;;  %s502_s25 = int_to_ptr.hbm [resolvable:$true] %s501_s25 }
  0x31   : > { %s503_s27 = scalar_lea.hbm %s502_s25, 8  ;;  %s507_s6 = scalar_lea.hbm %s732_s3, 16 }
  0x32   : > { %p504_p1 = scmp.ne.s32.totalorder %s502_s25, %s503_s27  ;;  %p508_p9 = scmp.lt.s32.totalorder %s502_s25, %s732_s3 }
  0x33   : > { %p509_p10 = scmp.lt.s32.totalorder %s507_s6, %s503_s27 }
  0x34   : > { %v422_v3 = vpop.eup %421  ;;  %p505_p4 = pnand %p504_p1, %p647_p3 }
  0x35   : > { %v209_v4 = vmul.f32 32.0, %v422_v3  ;;  %vm213_vm1 = vweird.f32 %v422_v3  ;;  %p510_p2 = por %p509_p10, %p508_p9 }
  0x36   : > { %p506_p8 = pneg %p505_p4 }
  0x37   : > { %v210_v5 = vsub.f32 1.0, %v209_v4 }
  0x38   : > { %p511_p11 = pnand %p510_p2, %p506_p8 }
  0x39   : > { %v211_v6 = vmul.f32 %v422_v3, %v210_v5 }
  0x3b   : > { %v212_v7 = vadd.f32 %v422_v3, %v211_v6 }
  0x3d   : > { %v214_v8 = vsel %vm213_vm1, %v422_v3, %v212_v7 }
  0xa2   : > { %v207_v9 = vpop.xlane.xlu0 %206 }
  0xa3   : > { %v215_v10 = vmul.f32 %v214_v8, %v207_v9 }
  0xa5   : > { %v216_v11 = vsub.f32 %v203_v0, %v215_v10 }
  0xa7   : > { %v217_v12 = vmul.f32 %v216_v11, %v216_v11 }
  0xa9   : > { %v218_v13 = vsel %vm204_vm0, %v217_v12, 0.0 }
  0xaa   : > { %219 = vadd.xlane.f32.xlu0 %v218_v13 }
 0x11d   : > { %v220_v14 = vpop.xlane.xlu0 %219 }
 0x11e   : > { %v221_v15 = vmul.f32 0.032258064, %v220_v14 }
 0x120   : > { %423 = vrsqrt.f32 %v221_v15  ;;  %vm229_vm2 = vcmp.eq.f32.partialorder %v221_v15, inf  ;;  %v232_v23 = vand.u32 2147483648, %v221_v15  ;;  %vm231_vm3 = vcmp.eq.f32.partialorder %v221_v15, 0.0 }
 0x126   : > { %v424_v16 = vpop.eup %423 }
 0x127   : > { %v223_v17 = vmul.f32 %v424_v16, %v221_v15 }
 0x129   : > { %v224_v18 = vmul.f32 %v424_v16, %v223_v17 }
 0x12b   : > { %v225_v19 = vmul.f32 0.5, %v224_v18 }
 0x12d   : > { %v226_v20 = vsub.f32 1.5, %v225_v19 }
 0x12f   : > { %v227_v21 = vmul.f32 %v424_v16, %v226_v20 }
 0x131   : > { %v228_v22 = vmul.f32 %v227_v21, %v221_v15 }
 0x133   : > { %v230_v24 = vsel %vm229_vm2, %v221_v15, %v228_v22 }
 0x134   : > { %v233_v25 = vsel %vm231_vm3, %v232_v23, %v230_v24 }
 0x135   : > { %v234_v26 = vadd.f32 1e-06, %v233_v25 }
 0x137   : > { %425 = vrcp.f32 %v234_v26 }
 0x13d   : > { %v426_v27 = vpop.eup %425 }
 0x13e   : > { %v236_v28 = vmul.f32 %v426_v27, %v234_v26 }
 0x140   : > { %v237_v29 = vsub.f32 2.0, %v236_v28 }
 0x142   : > { %v238_v30 = vmul.f32 %v426_v27, %v237_v29 }
 0x144   : > { %v240_v32 = vmul.f32 %v238_v30, %v216_v11 }
 0x146   : > { %v244_v34 = vmul.f32 %v419_v31, %v240_v32 }
 0x148   : > { %v249_v35 = vadd.f32 %v420_v33, %v244_v34 }
 0x14a   : > { %250 = vst.msk [vmem:[%s202_s21] sm:$0xff] %vm204_vm0, %v249_v35 }
 0x14b   : > { %514 = shalt.err (!%p511_p11)
}
 0x14c   : > { %367 = dma.vmem_to_hbm [thread:$0]  (%p647_p3), %s265_s22, 128, %s267_s24, %s252_s16  }
 0x14d PF: > { %s278_s4 = sand.u32 1, %s545_s12   ;;  %p738_p12 = scmp.ge.s32.totalorder %s557_s15, 2 }
 0x14e   : > { %s279_s9 = scalar_lea.sflag [#allocation4], %s278_s4 }
 0x14f   : > { %p378_p13 = pnand %p738_p12, %p616_p6 }
 0x151   : > { %p379_p0 = pneg %p378_p13 }
 0x153   : > { %540 = dma.done.wait (%p379_p0), %s279_s9, 128  }
 0x154   : > { %542 = vsyncadd (%p379_p0), %s279_s9, 4294967168  ;;  %p17_p5 = scmp.ge.s32.totalorder %s634_s26, 4   ;;  %s739_s12 = smov %s549_s13 }
 0x155   : > { %s740_s13 = smov %s553_s14  ;;  %s741_s14 = smov %s643_s29 }
 0x156   : > { %s742_s15 = smov %s634_s26  ;;  %19 = sbr.rel (!%p17_p5) target bundleno = 6 (0x6), region = 81 }
 0x15b   :  { %285 = vsyncpa [#allocation3], 1 }
 0x15c   :  { %287 = vsyncpa [#allocation3 + $0x1], 1 }
 0x15d   :  { %288 = vsyncpa [#allocation6], 1 }
 0x15e   :  { %289 = vsyncpa [#allocation4], 1 }
 0x15f   :  { %291 = vsyncpa [#allocation4 + $0x1], 1 }

</bundles_post_ra>
